<compile_context>
chip_gen: v7x
topology: tpu7x:2x2x1
jax: 0.10.0
libtpu: 0.0.40
codegen_flags: <defaults>
</compile_context>

<pallas_src>
import functools

import jax
import jax.numpy as jnp
from jax.experimental import pallas as pl
from jax.experimental.pallas import tpu as pltpu

NEG_SLOPE = 0.2
BN_EPS = 1e-5


def _leaky(v):
    return jnp.where(v > 0, v, NEG_SLOPE * v)


def _bn_train_folded(v, gamma, beta, inv_b):
    """Training-mode BatchNorm1d folded to one scale/shift.

    Single reduction pass over v (sum and sum-of-squares), then the whole
    normalization collapses to v * scale + shift with (1, N) rows.
    Moments are computed in f32; a maximum() guards tiny negative variance
    from the E[v^2] - mean^2 cancellation.
    """
    s = jnp.sum(v, axis=0, keepdims=True)
    ss = jnp.sum(v * v, axis=0, keepdims=True)
    mean = s * inv_b
    var = jnp.maximum(ss * inv_b - mean * mean, 0.0)
    scale = gamma * jax.lax.rsqrt(var + BN_EPS)
    shift = beta - mean * scale
    return v * scale + shift


def _resblock_kernel(use_fc3, final_nl, inv_b, *refs):
    if use_fc3:
        (x_ref, w1_ref, g1_ref, be1_ref,
         w2_ref, g2_ref, be2_ref, w3_ref, b3_ref, out_ref) = refs
    else:
        (x_ref, w1_ref, g1_ref, be1_ref,
         w2_ref, g2_ref, be2_ref, out_ref) = refs

    x_f32 = x_ref[...]                       # (B, Fin) f32
    x_bf = x_f32.astype(jnp.bfloat16)        # bf16 operand for the MXU

    # ---- shortcut path ----
    if use_fc3:
        xin = jnp.dot(x_bf, w3_ref[...], preferred_element_type=jnp.float32)
        xin = _leaky(xin + b3_ref[...])
    else:
        xin = x_f32

    # ---- fc1 -> bn1 -> leaky ---- (fc1 bias folded away by BN's mean subtraction)
    h = jnp.dot(x_bf, w1_ref[...], preferred_element_type=jnp.float32)
    h = _leaky(_bn_train_folded(h, g1_ref[...], be1_ref[...], inv_b))

    # ---- fc2 -> bn2 ---- (fc2 bias folded away as well)
    y = jnp.dot(h.astype(jnp.bfloat16), w2_ref[...],
                preferred_element_type=jnp.float32)
    y = _bn_train_folded(y, g2_ref[...], be2_ref[...], inv_b)

    out = xin + y
    if final_nl:
        out = _leaky(out)
    out_ref[...] = out.astype(out_ref.dtype)


def prepare_params(params, Fin, Fout):
    """One-time conversion of PyTorch-convention params into kernel operands.

    Linear weights are pre-transposed to (in, out) and cast to bf16 (halves the
    per-call weight DMA).  BN gamma/beta and fc3 bias become (1, N) f32 rows.
    fc1/fc2 biases are intentionally dropped: training-mode BN cancels them.
    """
    row = lambda v: v.reshape(1, -1).astype(jnp.float32)
    prep = {
        "w1t": params["w1"].T.astype(jnp.bfloat16),
        "g1": row(params["g1"]), "be1": row(params["be1"]),
        "w2t": params["w2"].T.astype(jnp.bfloat16),
        "g2": row(params["g2"]), "be2": row(params["be2"]),
    }
    if Fin != Fout:
        prep["w3t"] = params["w3"].T.astype(jnp.bfloat16)
        prep["b3"] = row(params["b3"])
    return prep


def resblock_forward(x, prep, *, Fin, Fout, final_nl=True):
    """x: (B, Fin) float32.  prep: output of prepare_params()."""
    B = x.shape[0]
    use_fc3 = (Fin != Fout)
    x = x.astype(jnp.float32)
    n_neurons = prep["w1t"].shape[1]

    args = [x, prep["w1t"], prep["g1"], prep["be1"],
            prep["w2t"], prep["g2"], prep["be2"]]
    if use_fc3:
        args += [prep["w3t"], prep["b3"]]

    # Full-array blocks (single grid step).  Feature dims should be multiples of
    # 128 and B a multiple of 8 for lane/sublane-dense loads & stores.
    full_spec = lambda a: pl.BlockSpec(a.shape, lambda: (0,) * a.ndim)

    # Rough VMEM budget (operands + out + h intermediate) with margin, so larger
    # problem sizes don't hit the default scoped-VMEM limit (16/32 MiB).
    est = sum(int(a.size) * a.dtype.itemsize for a in args)
    est += B * Fout * 4 + B * n_neurons * 4
    vmem_limit = int(min(max(4 * est, 16 * 2**20), 48 * 2**20))

    kernel = functools.partial(_resblock_kernel, use_fc3, final_nl, 1.0 / B)
    return pl.pallas_call(
        kernel,
        out_shape=jax.ShapeDtypeStruct((B, Fout), jnp.float32),
        in_specs=[full_spec(a) for a in args],
        out_specs=pl.BlockSpec((B, Fout), lambda: (0, 0)),
        compiler_params=pltpu.CompilerParams(vmem_limit_bytes=vmem_limit),
    )(*args)


def init_params(key, Fin, Fout, n_neurons):
    """Deterministic PyTorch-style init: U(-1/sqrt(fan_in), 1/sqrt(fan_in))."""
    ks = jax.random.split(key, 8)

    def lin(kw, kb, fan_in, fan_out):
        bound = 1.0 / jnp.sqrt(fan_in)
        w = jax.random.uniform(kw, (fan_out, fan_in), jnp.float32, -bound, bound)
        b = jax.random.uniform(kb, (fan_out,), jnp.float32, -bound, bound)
        return w, b

    w1, b1 = lin(ks[0], ks[1], Fin, n_neurons)
    w2, b2 = lin(ks[2], ks[3], n_neurons, Fout)
    params = {
        "w1": w1, "b1": b1,
        "g1": jnp.ones((n_neurons,), jnp.float32),
        "be1": jnp.zeros((n_neurons,), jnp.float32),
        "w2": w2, "b2": b2,
        "g2": jnp.ones((Fout,), jnp.float32),
        "be2": jnp.zeros((Fout,), jnp.float32),
    }
    if Fin != Fout:
        w3, b3 = lin(ks[4], ks[5], Fin, Fout)
        params["w3"] = w3
        params["b3"] = b3
    return params


def resblock_reference(x, params, *, Fin, Fout, final_nl=True,
                       matmul_dtype=jnp.float32):
    """Pure-JAX reference mirroring the PyTorch module (training-mode BN).

    Keeps the fc1/fc2 biases and the two-pass variance of torch.  With
    matmul_dtype=bfloat16 it applies the same matmul-operand rounding as the
    kernel so the comparison can be tight.
    """
    def lin(v, w, b):
        o = jnp.dot(v.astype(matmul_dtype), w.T.astype(matmul_dtype),
                    preferred_element_type=jnp.float32)
        return o + b

    def bn(v, g, b):
        m = jnp.mean(v, axis=0, keepdims=True)
        va = jnp.mean((v - m) ** 2, axis=0, keepdims=True)
        return (v - m) / jnp.sqrt(va + BN_EPS) * g + b

    if Fin != Fout:
        xin = _leaky(lin(x, params["w3"], params["b3"]))
    else:
        xin = x
    h = _leaky(bn(lin(x, params["w1"], params["b1"]), params["g1"], params["be1"]))
    y = bn(lin(h, params["w2"], params["b2"]), params["g2"], params["be2"])
    out = xin + y
    return _leaky(out) if final_nl else out


if __name__ == "__main__":
    n_neurons = 256
    key = jax.random.PRNGKey(0)
    k1, k2, k3, k4 = jax.random.split(key, 4)

    # --- Case 1: Fin != Fout  ->  fc3 shortcut variant ---
    B, Fin, Fout = 16, 128, 256          # lane/sublane-friendly sizes
    x = jax.random.normal(k1, (B, Fin), jnp.float32)
    params = init_params(k2, Fin, Fout, n_neurons)
    prep = prepare_params(params, Fin, Fout)

    out = jax.block_until_ready(
        resblock_forward(x, prep, Fin=Fin, Fout=Fout, final_nl=True))
    assert out.shape == (B, Fout)

    ref_bf = resblock_reference(x, params, Fin=Fin, Fout=Fout, final_nl=True,
                                matmul_dtype=jnp.bfloat16)
    ref_f32 = resblock_reference(x, params, Fin=Fin, Fout=Fout, final_nl=True,
                                 matmul_dtype=jnp.float32)
    assert jnp.allclose(out, ref_bf, atol=5e-3, rtol=5e-3), \
        "mismatch vs bf16-matched reference (fc3 path)"
    assert jnp.allclose(out, ref_f32, atol=1e-1, rtol=1e-1), \
        "mismatch vs f32 reference (fc3 path)"

    # --- Case 2: Fin == Fout  ->  identity shortcut variant (no w3/b3 shipped) ---
    B2, F = 16, 256
    x2 = jax.random.normal(k3, (B2, F), jnp.float32)
    params2 = init_params(k4, F, F, n_neurons)
    prep2 = prepare_params(params2, F, F)

    out2 = jax.block_until_ready(
        resblock_forward(x2, prep2, Fin=F, Fout=F, final_nl=False))
    assert out2.shape == (B2, F)

    ref2_bf = resblock_reference(x2, params2, Fin=F, Fout=F, final_nl=False,
                                 matmul_dtype=jnp.bfloat16)
    assert jnp.allclose(out2, ref2_bf, atol=5e-3, rtol=5e-3), \
        "mismatch vs bf16-matched reference (identity path)"

    print("KERNEL_OK")
</pallas_src>

<mosaic_0001>
module attributes {stable_mosaic.version = 11 : i64} {
  func.func @_resblock_kernel(%arg0: memref<16x128xf32, #tpu.memory_space<vmem>>, %arg1: memref<128x256xbf16, #tpu.memory_space<vmem>>, %arg2: memref<1x256xf32, #tpu.memory_space<vmem>>, %arg3: memref<1x256xf32, #tpu.memory_space<vmem>>, %arg4: memref<256x256xbf16, #tpu.memory_space<vmem>>, %arg5: memref<1x256xf32, #tpu.memory_space<vmem>>, %arg6: memref<1x256xf32, #tpu.memory_space<vmem>>, %arg7: memref<128x256xbf16, #tpu.memory_space<vmem>>, %arg8: memref<1x256xf32, #tpu.memory_space<vmem>>, %arg9: memref<16x256xf32, #tpu.memory_space<vmem>>) attributes {dimension_semantics = [], scalar_prefetch = 0 : i64, scratch_operands = 0 : i64, tpu.core_type = #tpu.core_type<tc>} {
    %c0 = arith.constant 0 : index
    %c0_0 = arith.constant 0 : index
    %0 = vector.load %arg0[%c0, %c0_0] : memref<16x128xf32, #tpu.memory_space<vmem>>, vector<16x128xf32>
    %1 = arith.truncf %0 : vector<16x128xf32> to vector<16x128xbf16>
    %c0_1 = arith.constant 0 : index
    %c0_2 = arith.constant 0 : index
    %2 = vector.load %arg7[%c0_1, %c0_2] : memref<128x256xbf16, #tpu.memory_space<vmem>>, vector<128x256xbf16>
    %cst = arith.constant dense<0.000000e+00> : vector<16x256xf32>
    %3 = tpu.matmul %1, %2, %cst {dimension_numbers = #tpu.dot_dimension_numbers<[1], [0], [0], [1], [0, 0, 1, 1], [], []>} : vector<16x128xbf16>, vector<128x256xbf16>, vector<16x256xf32> -> vector<16x256xf32>
    %c0_3 = arith.constant 0 : index
    %c0_4 = arith.constant 0 : index
    %4 = vector.load %arg8[%c0_3, %c0_4] : memref<1x256xf32, #tpu.memory_space<vmem>>, vector<1x256xf32>
    %5 = vector.broadcast %4 : vector<1x256xf32> to vector<16x256xf32>
    %6 = arith.addf %3, %5 : vector<16x256xf32>
    %cst_5 = arith.constant 0.000000e+00 : f32
    %7 = vector.broadcast %cst_5 : f32 to vector<16x256xf32>
    %8 = arith.cmpf ogt, %6, %7 : vector<16x256xf32>
    %cst_6 = arith.constant 2.000000e-01 : f32
    %9 = vector.broadcast %cst_6 : f32 to vector<16x256xf32>
    %10 = arith.mulf %9, %6 : vector<16x256xf32>
    %11 = arith.select %8, %6, %10 : vector<16x256xi1>, vector<16x256xf32>
    %c0_7 = arith.constant 0 : index
    %c0_8 = arith.constant 0 : index
    %12 = vector.load %arg1[%c0_7, %c0_8] : memref<128x256xbf16, #tpu.memory_space<vmem>>, vector<128x256xbf16>
    %cst_9 = arith.constant dense<0.000000e+00> : vector<16x256xf32>
    %13 = tpu.matmul %1, %12, %cst_9 {dimension_numbers = #tpu.dot_dimension_numbers<[1], [0], [0], [1], [0, 0, 1, 1], [], []>} : vector<16x128xbf16>, vector<128x256xbf16>, vector<16x256xf32> -> vector<16x256xf32>
    %c0_10 = arith.constant 0 : index
    %c0_11 = arith.constant 0 : index
    %14 = vector.load %arg2[%c0_10, %c0_11] : memref<1x256xf32, #tpu.memory_space<vmem>>, vector<1x256xf32>
    %c0_12 = arith.constant 0 : index
    %c0_13 = arith.constant 0 : index
    %15 = vector.load %arg3[%c0_12, %c0_13] : memref<1x256xf32, #tpu.memory_space<vmem>>, vector<1x256xf32>
    %cst_14 = arith.constant dense<0.000000e+00> : vector<256xf32>
    %16 = vector.multi_reduction <add>, %13, %cst_14 [0] : vector<16x256xf32> to vector<256xf32>
    %17 = vector.shape_cast %16 : vector<256xf32> to vector<1x256xf32>
    %18 = arith.mulf %13, %13 : vector<16x256xf32>
    %cst_15 = arith.constant dense<0.000000e+00> : vector<256xf32>
    %19 = vector.multi_reduction <add>, %18, %cst_15 [0] : vector<16x256xf32> to vector<256xf32>
    %20 = vector.shape_cast %19 : vector<256xf32> to vector<1x256xf32>
    %cst_16 = arith.constant 6.250000e-02 : f32
    %21 = vector.broadcast %cst_16 : f32 to vector<1x256xf32>
    %22 = arith.mulf %17, %21 : vector<1x256xf32>
    %cst_17 = arith.constant 6.250000e-02 : f32
    %23 = vector.broadcast %cst_17 : f32 to vector<1x256xf32>
    %24 = arith.mulf %20, %23 : vector<1x256xf32>
    %25 = arith.mulf %22, %22 : vector<1x256xf32>
    %26 = arith.subf %24, %25 : vector<1x256xf32>
    %cst_18 = arith.constant 0.000000e+00 : f32
    %27 = vector.broadcast %cst_18 : f32 to vector<1x256xf32>
    %28 = arith.maximumf %26, %27 : vector<1x256xf32>
    %cst_19 = arith.constant 9.99999974E-6 : f32
    %29 = vector.broadcast %cst_19 : f32 to vector<1x256xf32>
    %30 = arith.addf %28, %29 : vector<1x256xf32>
    %31 = math.rsqrt %30 : vector<1x256xf32>
    %32 = arith.mulf %14, %31 : vector<1x256xf32>
    %33 = arith.mulf %22, %32 : vector<1x256xf32>
    %34 = arith.subf %15, %33 : vector<1x256xf32>
    %35 = vector.broadcast %32 : vector<1x256xf32> to vector<16x256xf32>
    %36 = arith.mulf %13, %35 : vector<16x256xf32>
    %37 = vector.broadcast %34 : vector<1x256xf32> to vector<16x256xf32>
    %38 = arith.addf %36, %37 : vector<16x256xf32>
    %cst_20 = arith.constant 0.000000e+00 : f32
    %39 = vector.broadcast %cst_20 : f32 to vector<16x256xf32>
    %40 = arith.cmpf ogt, %38, %39 : vector<16x256xf32>
    %cst_21 = arith.constant 2.000000e-01 : f32
    %41 = vector.broadcast %cst_21 : f32 to vector<16x256xf32>
    %42 = arith.mulf %41, %38 : vector<16x256xf32>
    %43 = arith.select %40, %38, %42 : vector<16x256xi1>, vector<16x256xf32>
    %44 = arith.truncf %43 : vector<16x256xf32> to vector<16x256xbf16>
    %c0_22 = arith.constant 0 : index
    %c0_23 = arith.constant 0 : index
    %45 = vector.load %arg4[%c0_22, %c0_23] : memref<256x256xbf16, #tpu.memory_space<vmem>>, vector<256x256xbf16>
    %cst_24 = arith.constant dense<0.000000e+00> : vector<16x256xf32>
    %46 = tpu.matmul %44, %45, %cst_24 {dimension_numbers = #tpu.dot_dimension_numbers<[1], [0], [0], [1], [0, 0, 1, 1], [], []>} : vector<16x256xbf16>, vector<256x256xbf16>, vector<16x256xf32> -> vector<16x256xf32>
    %c0_25 = arith.constant 0 : index
    %c0_26 = arith.constant 0 : index
    %47 = vector.load %arg5[%c0_25, %c0_26] : memref<1x256xf32, #tpu.memory_space<vmem>>, vector<1x256xf32>
    %c0_27 = arith.constant 0 : index
    %c0_28 = arith.constant 0 : index
    %48 = vector.load %arg6[%c0_27, %c0_28] : memref<1x256xf32, #tpu.memory_space<vmem>>, vector<1x256xf32>
    %cst_29 = arith.constant dense<0.000000e+00> : vector<256xf32>
    %49 = vector.multi_reduction <add>, %46, %cst_29 [0] : vector<16x256xf32> to vector<256xf32>
    %50 = vector.shape_cast %49 : vector<256xf32> to vector<1x256xf32>
    %51 = arith.mulf %46, %46 : vector<16x256xf32>
    %cst_30 = arith.constant dense<0.000000e+00> : vector<256xf32>
    %52 = vector.multi_reduction <add>, %51, %cst_30 [0] : vector<16x256xf32> to vector<256xf32>
    %53 = vector.shape_cast %52 : vector<256xf32> to vector<1x256xf32>
    %cst_31 = arith.constant 6.250000e-02 : f32
    %54 = vector.broadcast %cst_31 : f32 to vector<1x256xf32>
    %55 = arith.mulf %50, %54 : vector<1x256xf32>
    %cst_32 = arith.constant 6.250000e-02 : f32
    %56 = vector.broadcast %cst_32 : f32 to vector<1x256xf32>
    %57 = arith.mulf %53, %56 : vector<1x256xf32>
    %58 = arith.mulf %55, %55 : vector<1x256xf32>
    %59 = arith.subf %57, %58 : vector<1x256xf32>
    %cst_33 = arith.constant 0.000000e+00 : f32
    %60 = vector.broadcast %cst_33 : f32 to vector<1x256xf32>
    %61 = arith.maximumf %59, %60 : vector<1x256xf32>
    %cst_34 = arith.constant 9.99999974E-6 : f32
    %62 = vector.broadcast %cst_34 : f32 to vector<1x256xf32>
    %63 = arith.addf %61, %62 : vector<1x256xf32>
    %64 = math.rsqrt %63 : vector<1x256xf32>
    %65 = arith.mulf %47, %64 : vector<1x256xf32>
    %66 = arith.mulf %55, %65 : vector<1x256xf32>
    %67 = arith.subf %48, %66 : vector<1x256xf32>
    %68 = vector.broadcast %65 : vector<1x256xf32> to vector<16x256xf32>
    %69 = arith.mulf %46, %68 : vector<16x256xf32>
    %70 = vector.broadcast %67 : vector<1x256xf32> to vector<16x256xf32>
    %71 = arith.addf %69, %70 : vector<16x256xf32>
    %72 = arith.addf %11, %71 : vector<16x256xf32>
    %cst_35 = arith.constant 0.000000e+00 : f32
    %73 = vector.broadcast %cst_35 : f32 to vector<16x256xf32>
    %74 = arith.cmpf ogt, %72, %73 : vector<16x256xf32>
    %cst_36 = arith.constant 2.000000e-01 : f32
    %75 = vector.broadcast %cst_36 : f32 to vector<16x256xf32>
    %76 = arith.mulf %75, %72 : vector<16x256xf32>
    %77 = arith.select %74, %72, %76 : vector<16x256xi1>, vector<16x256xf32>
    %c0_37 = arith.constant 0 : index
    %c0_38 = arith.constant 0 : index
    %78 = vector.load %arg9[%c0_37, %c0_38] : memref<16x256xf32, #tpu.memory_space<vmem>>, vector<16x256xf32>
    tpu.vector_store %arg9[%c0_37, %c0_38], %77 {strides = array<i32>} : memref<16x256xf32, #tpu.memory_space<vmem>>, vector<16x256xf32>,
    return
  }
}

</mosaic_0001>

<bundles_post_ra>
// kernel: tpu_custom_call.1
= control target key start
LH: loop header
LB: loop body
LE: loop exit
PB: predicated region body
PF: predicated region fallthrough
CT: control target
= control target key end

     0   :  { %14 = vsyncpa [#allocation3], 0  ;;  %s1455_s0 = inlined_call_operand.hbm [shape: f32[16,128], index: 0, kind: input, shape index: {}]   ;;  %s1456_s1 = inlined_call_operand.hbm [shape: bf16[128,256], index: 1, kind: input, shape index: {}]   ;;  %s1457_s2 = inlined_call_operand.vmem [shape: f32[1,256], index: 2, kind: input, shape index: {}]   ;;  %s1458_s3 = inlined_call_operand.vmem [shape: f32[1,256], index: 3, kind: input, shape index: {}]   ;;  %s1459_s4 = inlined_call_operand.hbm [shape: bf16[256,256], index: 4, kind: input, shape index: {}]   ;;  %s1460_s5 = inlined_call_operand.vmem [shape: f32[1,256], index: 5, kind: input, shape index: {}]   ;;  %s1461_s6 = inlined_call_operand.vmem [shape: f32[1,256], index: 6, kind: input, shape index: {}]   ;;  %s1462_s7 = inlined_call_operand.hbm [shape: bf16[128,256], index: 7, kind: input, shape index: {}]   ;;  %s1463_s8 = inlined_call_operand.vmem [shape: f32[1,256], index: 8, kind: input, shape index: {}]   ;;  %s1464_s9 = inlined_call_operand.hbm [shape: f32[16,256], index: 9, kind: output, shape index: {}]  }
   0x1   :  { %15 = vsyncpa [#allocation6], 0 }
   0x2   :  { %16 = vsyncpa [#allocation9], 0 }
   0x3   :  { %17 = vsyncpa [#allocation4], 0  ;;  %s1215_s30 = smov [#allocation5]   ;;  %s1216_s11 = smov [#allocation2]  }
   0x4   :  { %s35_s10 = sshll.u32 %s1215_s30, 4  ;;  %s23_s12 = sshll.u32 %s1216_s11, 4  ;;  %s36_s10 = int_to_ptr.vmem [resolvable:$true] %s35_s10  ;;  %s1276_s12 = int_to_ptr.vmem [resolvable:$true] %s23_s12 }
   0x5   :  { %s1097_s15 = scalar_lea.hbm %s1456_s1, 2048 }
   0x6   :  { %p1098_p0 = scmp.ne.s32.totalorder %s1456_s1, %s1097_s15  ;;  %p1101_p1 = scmp.lt.u32.totalorder %s1097_s15, %s1456_s1 }
   0x8   :  { %p1103_p2 = pnand %p1101_p1, %p1098_p0 }
   0xa   :  { %1106 = shalt.err (!%p1103_p2)
}
   0xb   :  { %s1107_s20 = scalar_lea.vmem %s36_s10, 2048  ;;  %p1112_p4 = scmp.lt.s32.totalorder %s36_s10, %s36_s10 }
   0xc   :  { %p1108_p3 = scmp.ne.s32.totalorder %s36_s10, %s1107_s20  ;;  %p1113_p5 = scmp.lt.s32.totalorder %s1107_s20, %s1107_s20 }
   0xe   :  { %p1114_p6 = por %p1113_p5, %p1112_p4 }
  0x10   :  { %p1115_p7 = pnand %p1114_p6, %p1108_p3 }
  0x12   :  { %1118 = shalt.err (!%p1115_p7)
}
  0x13   :  { %s1217_s21 = smov 128   ;;  %s1218_s22 = smov 8  }
  0x14   :  { %41 = dma.hbm_to_vmem [thread:$0]  %s1456_s1, 2048, %s36_s10, [#allocation6], %s1217_s21, %s1217_s21, %s1218_s22  }
  0x15   :  { %s1119_s27 = scalar_lea.hbm %s1455_s0, 256 }
  0x16   :  { %p1120_p8 = scmp.ne.s32.totalorder %s1455_s0, %s1119_s27  ;;  %p1123_p9 = scmp.lt.u32.totalorder %s1119_s27, %s1455_s0 }
  0x18   :  { %p1125_p10 = pnand %p1123_p9, %p1120_p8 }
  0x1a   :  { %1128 = shalt.err (!%p1125_p10)
}
  0x1b   :  { %s1129_s13 = scalar_lea.vmem %s1276_s12, 256  ;;  %p1134_p12 = scmp.lt.s32.totalorder %s1276_s12, %s1276_s12 }
  0x1c   :  { %p1130_p11 = scmp.ne.s32.totalorder %s1276_s12, %s1129_s13  ;;  %p1135_p13 = scmp.lt.s32.totalorder %s1129_s13, %s1129_s13 }
  0x1e   :  { %p1136_p0 = por %p1135_p13, %p1134_p12 }
  0x20   :  { %p1137_p1 = pnand %p1136_p0, %p1130_p11 }
  0x22   :  { %1140 = shalt.err (!%p1137_p1)
}
  0x23   :  { %29 = dma.hbm_to_vmem [thread:$0]  %s1455_s0, 256, %s1276_s12, [#allocation3], %s1217_s21, %s1217_s21, %s1218_s22  }
  0x24   :  { %s1219_s14 = smov [#allocation7]   ;;  %s1220_s16 = smov [#allocation8]  }
  0x25   :  { %s51_s15 = sshll.u32 %s1219_s14, 4  ;;  %s67_s17 = sshll.u32 %s1220_s16, 4  ;;  %s52_s15 = int_to_ptr.vmem [resolvable:$true] %s51_s15  ;;  %s1313_s17 = int_to_ptr.vmem [resolvable:$true] %s67_s17 }
  0x26   :  { %s1141_s20 = scalar_lea.hbm %s1459_s4, 4096 }
  0x27   :  { %p1142_p2 = scmp.ne.s32.totalorder %s1459_s4, %s1141_s20  ;;  %p1145_p3 = scmp.lt.u32.totalorder %s1141_s20, %s1459_s4 }
  0x29   :  { %p1147_p4 = pnand %p1145_p3, %p1142_p2 }
  0x2b   :  { %1150 = shalt.err (!%p1147_p4)
}
  0x2c   :  { %s1151_s0 = scalar_lea.vmem %s52_s15, 4096  ;;  %p1156_p6 = scmp.lt.s32.totalorder %s52_s15, %s52_s15 }
  0x2d   :  { %p1152_p5 = scmp.ne.s32.totalorder %s52_s15, %s1151_s0  ;;  %p1157_p7 = scmp.lt.s32.totalorder %s1151_s0, %s1151_s0 }
  0x2f   :  { %p1158_p8 = por %p1157_p7, %p1156_p6 }
  0x31   :  { %p1159_p9 = pnand %p1158_p8, %p1152_p5 }
  0x33   :  { %1162 = shalt.err (!%p1159_p9)
}
  0x34   :  { %57 = dma.hbm_to_vmem [thread:$0]  %s1459_s4, 4096, %s52_s15, [#allocation6], %s1217_s21, %s1217_s21, %s1218_s22  }
  0x35   :  { %s1163_s30 = scalar_lea.hbm %s1462_s7, 2048 }
  0x36   :  { %p1164_p10 = scmp.ne.s32.totalorder %s1462_s7, %s1163_s30  ;;  %p1167_p11 = scmp.lt.u32.totalorder %s1163_s30, %s1462_s7 }
  0x38   :  { %p1169_p12 = pnand %p1167_p11, %p1164_p10 }
  0x3a   :  { %1172 = shalt.err (!%p1169_p12)
}
  0x3b   :  { %s1173_s14 = scalar_lea.vmem %s1313_s17, 2048  ;;  %p1178_p0 = scmp.lt.s32.totalorder %s1313_s17, %s1313_s17 }
  0x3c   :  { %p1174_p13 = scmp.ne.s32.totalorder %s1313_s17, %s1173_s14  ;;  %p1179_p1 = scmp.lt.s32.totalorder %s1173_s14, %s1173_s14 }
  0x3e   :  { %p1180_p2 = por %p1179_p1, %p1178_p0 }
  0x40   :  { %p1181_p3 = pnand %p1180_p2, %p1174_p13 }
  0x42   :  { %1184 = shalt.err (!%p1181_p3)
}
  0x43   :  { %73 = dma.hbm_to_vmem [thread:$0]  %s1462_s7, 2048, %s1313_s17, [#allocation9], %s1217_s21, %s1217_s21, %s1218_s22  }
  0x44   :  { %1207 = dma.done.wait [#allocation3], 256  }
  0x45   :  { %1208 = vsyncadd [#allocation3], 4294967040 }
  0x46   :  { %1209 = dma.done.wait [#allocation6], 6144  }
  0x47   :  { %1210 = vsyncadd [#allocation6], 4294961152 }
  0x48   :  { %1211 = dma.done.wait [#allocation9], 2048  }
  0x49   :  { %1212 = vsyncadd [#allocation9], 4294965248  ;;  %v1221_v0 = vmov 0   ;;  %v993_v1 = vld [vmem:[#allocation8 + $0x4] ss:$8 sps:$4 sm:$0xff]   ;;  %v89_v17 = vld [vmem:[#allocation2] sm:$0xff] }
  0x4a   :  { %232 = vmatprep.mubr.bf16.mxu1 %v1221_v0  ;;  %v995_v2 = vld [vmem:[#allocation8] ss:$8 sps:$4 sm:$0xff]   ;;  %200 = vmatprep.subr.bf16.mxu1 %v993_v1  ;;  %v996_v3 = vld [vmem:[#allocation8 + $0x14] ss:$8 sps:$4 sm:$0xff]   ;;  %v998_v4 = vld [vmem:[#allocation8 + $0x10] ss:$8 sps:$4 sm:$0xff]  }
  0x4b   :  { %201 = vmatpush1.bf16.msra.mxu1 %v995_v2  ;;  %v999_v5 = vld [vmem:[#allocation8 + $0x24] ss:$8 sps:$4 sm:$0xff]   ;;  %v1001_v6 = vld [vmem:[#allocation8 + $0x20] ss:$8 sps:$4 sm:$0xff]   ;;  %v1002_v7 = vld [vmem:[#allocation8 + $0x34] ss:$8 sps:$4 sm:$0xff]  }
  0x4c   :  { %202 = vmatprep.subr.bf16.mxu1 %v996_v3  ;;  %v1004_v8 = vld [vmem:[#allocation8 + $0x30] ss:$8 sps:$4 sm:$0xff]   ;;  %v1005_v9 = vld [vmem:[#allocation8 + $0x44] ss:$8 sps:$4 sm:$0xff]   ;;  %v1007_v10 = vld [vmem:[#allocation8 + $0x40] ss:$8 sps:$4 sm:$0xff]  }
  0x4d   :  { %v1008_v11 = vld [vmem:[#allocation8 + $0x54] ss:$8 sps:$4 sm:$0xff]   ;;  %v1010_v12 = vld [vmem:[#allocation8 + $0x50] ss:$8 sps:$4 sm:$0xff]   ;;  %v1011_v13 = vld [vmem:[#allocation8 + $0x64] ss:$8 sps:$4 sm:$0xff]  }
  0x4e   :  { %v1013_v14 = vld [vmem:[#allocation8 + $0x60] ss:$8 sps:$4 sm:$0xff]   ;;  %v1014_v15 = vld [vmem:[#allocation8 + $0x74] ss:$8 sps:$4 sm:$0xff]   ;;  %v1016_v16 = vld [vmem:[#allocation8 + $0x70] ss:$8 sps:$4 sm:$0xff]  }
  0x4f   :  { %203 = vmatpush1.bf16.msra.mxu1 %v998_v4  ;;  %v90_v18 = vld [vmem:[#allocation2 + $0x8] sm:$0xff]  ;;  %v1019_v19 = vld [vmem:[#allocation5 + $0x4] ss:$8 sps:$4 sm:$0xff]   ;;  %v1017_v20 = vld [vmem:[#allocation5] ss:$8 sps:$4 sm:$0xff]  }
  0x50   :  { %204 = vmatprep.subr.bf16.mxu1 %v999_v5  ;;  %v91_v21 = vpack.c.bf16 %v90_v18, %v89_v17  ;;  %v1022_v22 = vld [vmem:[#allocation5 + $0x14] ss:$8 sps:$4 sm:$0xff]   ;;  %v1020_v23 = vld [vmem:[#allocation5 + $0x10] ss:$8 sps:$4 sm:$0xff]   ;;  %v1025_v24 = vld [vmem:[#allocation5 + $0x24] ss:$8 sps:$4 sm:$0xff]  }
  0x51   :  { %v1023_v25 = vld [vmem:[#allocation5 + $0x20] ss:$8 sps:$4 sm:$0xff]   ;;  %v1028_v26 = vld [vmem:[#allocation5 + $0x34] ss:$8 sps:$4 sm:$0xff]   ;;  %v1026_v27 = vld [vmem:[#allocation5 + $0x30] ss:$8 sps:$4 sm:$0xff]  }
  0x52   :  { %v1031_v28 = vld [vmem:[#allocation5 + $0x44] ss:$8 sps:$4 sm:$0xff]   ;;  %v1029_v29 = vld [vmem:[#allocation5 + $0x40] ss:$8 sps:$4 sm:$0xff]   ;;  %v1034_v30 = vld [vmem:[#allocation5 + $0x54] ss:$8 sps:$4 sm:$0xff]  }
  0x53   :  { %205 = vmatpush1.bf16.msra.mxu1 %v1001_v6  ;;  %v1032_v31 = vld [vmem:[#allocation5 + $0x50] ss:$8 sps:$4 sm:$0xff]   ;;  %v1037_v32 = vld [vmem:[#allocation5 + $0x64] ss:$8 sps:$4 sm:$0xff]   ;;  %v1035_v33 = vld [vmem:[#allocation5 + $0x60] ss:$8 sps:$4 sm:$0xff]  }
  0x54   :  { %206 = vmatprep.subr.bf16.mxu1 %v1002_v7  ;;  %v1040_v34 = vld [vmem:[#allocation5 + $0x74] ss:$8 sps:$4 sm:$0xff]   ;;  %v1038_v35 = vld [vmem:[#allocation5 + $0x70] ss:$8 sps:$4 sm:$0xff]   ;;  %v1041_v36 = vld [vmem:[#allocation7 + $0x4] ss:$8 sps:$4 sm:$0xff]  }
  0x55   :  { %v1043_v37 = vld [vmem:[#allocation7] ss:$8 sps:$4 sm:$0xff]   ;;  %718 = vmatprep.subr.bf16.mxu0 %v1041_v36  ;;  %v1044_v38 = vld [vmem:[#allocation7 + $0x14] ss:$8 sps:$4 sm:$0xff]   ;;  %v1046_v39 = vld [vmem:[#allocation7 + $0x10] ss:$8 sps:$4 sm:$0xff]  }
  0x56   :  { %719 = vmatpush1.bf16.msra.mxu0 %v1043_v37  ;;  %v1047_v40 = vld [vmem:[#allocation7 + $0x24] ss:$8 sps:$4 sm:$0xff]   ;;  %v1049_v41 = vld [vmem:[#allocation7 + $0x20] ss:$8 sps:$4 sm:$0xff]   ;;  %v1050_v42 = vld [vmem:[#allocation7 + $0x34] ss:$8 sps:$4 sm:$0xff]  }
  0x57   :  { %207 = vmatpush1.bf16.msra.mxu1 %v1004_v8  ;;  %720 = vmatprep.subr.bf16.mxu0 %v1044_v38  ;;  %v1052_v43 = vld [vmem:[#allocation7 + $0x30] ss:$8 sps:$4 sm:$0xff]   ;;  %v1053_v44 = vld [vmem:[#allocation7 + $0x44] ss:$8 sps:$4 sm:$0xff]   ;;  %v1055_v45 = vld [vmem:[#allocation7 + $0x40] ss:$8 sps:$4 sm:$0xff]  }
  0x58   :  { %208 = vmatprep.subr.bf16.mxu1 %v1005_v9  ;;  %v1056_v46 = vld [vmem:[#allocation7 + $0x54] ss:$8 sps:$4 sm:$0xff]   ;;  %v1058_v47 = vld [vmem:[#allocation7 + $0x50] ss:$8 sps:$4 sm:$0xff]   ;;  %v1059_v48 = vld [vmem:[#allocation7 + $0x64] ss:$8 sps:$4 sm:$0xff]  }
  0x59   :  { %v1061_v49 = vld [vmem:[#allocation7 + $0x60] ss:$8 sps:$4 sm:$0xff]   ;;  %v1062_v50 = vld [vmem:[#allocation7 + $0x74] ss:$8 sps:$4 sm:$0xff]   ;;  %v1064_v51 = vld [vmem:[#allocation7 + $0x70] ss:$8 sps:$4 sm:$0xff]  }
  0x5a   :  { %721 = vmatpush1.bf16.msra.mxu0 %v1046_v39  ;;  %v1065_v52 = vld [vmem:[#allocation7 + $0x84] ss:$8 sps:$4 sm:$0xff]   ;;  %v1067_v53 = vld [vmem:[#allocation7 + $0x80] ss:$8 sps:$4 sm:$0xff]   ;;  %v1068_v54 = vld [vmem:[#allocation7 + $0x94] ss:$8 sps:$4 sm:$0xff]  }
  0x5b   :  { %209 = vmatpush1.bf16.msra.mxu1 %v1007_v10  ;;  %722 = vmatprep.subr.bf16.mxu0 %v1047_v40  ;;  %v1070_v55 = vld [vmem:[#allocation7 + $0x90] ss:$8 sps:$4 sm:$0xff]   ;;  %v1071_v56 = vld [vmem:[#allocation7 + $0xa4] ss:$8 sps:$4 sm:$0xff]   ;;  %v1073_v57 = vld [vmem:[#allocation7 + $0xa0] ss:$8 sps:$4 sm:$0xff]  }
  0x5c   :  { %210 = vmatprep.subr.bf16.mxu1 %v1008_v11  ;;  %v1074_v58 = vld [vmem:[#allocation7 + $0xb4] ss:$8 sps:$4 sm:$0xff]   ;;  %v1076_v59 = vld [vmem:[#allocation7 + $0xb0] ss:$8 sps:$4 sm:$0xff]   ;;  %v1077_v60 = vld [vmem:[#allocation7 + $0xc4] ss:$8 sps:$4 sm:$0xff]  }
  0x5d   :  { %v1079_v61 = vld [vmem:[#allocation7 + $0xc0] ss:$8 sps:$4 sm:$0xff]   ;;  %v1080_v62 = vld [vmem:[#allocation7 + $0xd4] ss:$8 sps:$4 sm:$0xff]   ;;  %v1082_v63 = vld [vmem:[#allocation7 + $0xd0] ss:$8 sps:$4 sm:$0xff]  }
  0x5e   :  { %723 = vmatpush1.bf16.msra.mxu0 %v1049_v41  ;;  %v1085_v1 = vld [vmem:[#allocation7 + $0xe0] ss:$8 sps:$4 sm:$0xff]   ;;  %v1086_v2 = vld [vmem:[#allocation7 + $0xf4] ss:$8 sps:$4 sm:$0xff]   ;;  %v1088_v3 = vld [vmem:[#allocation7 + $0xf0] ss:$8 sps:$4 sm:$0xff]  }
  0x5f   :  { %211 = vmatpush1.bf16.msra.mxu1 %v1010_v12  ;;  %724 = vmatprep.subr.bf16.mxu0 %v1050_v42 }
  0x60   :  { %212 = vmatprep.subr.bf16.mxu1 %v1011_v13 }
  0x62   :  { %725 = vmatpush1.bf16.msra.mxu0 %v1052_v43 }
  0x63   :  { %213 = vmatpush1.bf16.msra.mxu1 %v1013_v14  ;;  %726 = vmatprep.subr.bf16.mxu0 %v1053_v44 }
  0x64   :  { %214 = vmatprep.subr.bf16.mxu1 %v1014_v15 }
  0x66   :  { %727 = vmatpush1.bf16.msra.mxu0 %v1055_v45 }
  0x67   :  { %215 = vmatpush1.bf16.msra.mxu1 %v1016_v16  ;;  %728 = vmatprep.subr.bf16.mxu0 %v1056_v46 }
  0x68   :  { %351 = vmatprep.subr.bf16.mxu1 %v1019_v19 }
  0x6a   :  { %233 = vmatmul.mubr.bf16.vlgmr.msra.gmra.mrb[0].mxu1 %v91_v21  ;;  %729 = vmatpush1.bf16.msra.mxu0 %v1058_v47 }
  0x6b   :  { %352 = vmatpush1.bf16.msra.mxu1 %v1017_v20  ;;  %383 = vmatprep.mubr.bf16.mxu1 %v1221_v0  ;;  %v1083_v0 = vld [vmem:[#allocation7 + $0xe4] ss:$8 sps:$4 sm:$0xff]  }
  0x6c   :  { %353 = vmatprep.subr.bf16.mxu1 %v1022_v22  ;;  %730 = vmatprep.subr.bf16.mxu0 %v1059_v48 }
  0x6e   :  { %731 = vmatpush1.bf16.msra.mxu0 %v1061_v49 }
  0x6f   :  { %354 = vmatpush1.bf16.msra.mxu1 %v1020_v23  ;;  %732 = vmatprep.subr.bf16.mxu0 %v1062_v50 }
  0x70   :  { %355 = vmatprep.subr.bf16.mxu1 %v1025_v24 }
  0x72   :  { %733 = vmatpush1.bf16.msra.mxu0 %v1064_v51 }
  0x73   :  { %356 = vmatpush1.bf16.msra.mxu1 %v1023_v25  ;;  %734 = vmatprep.subr.bf16.mxu0 %v1065_v52 }
  0x74   :  { %357 = vmatprep.subr.bf16.mxu1 %v1028_v26 }
  0x76   :  { %735 = vmatpush1.bf16.msra.mxu0 %v1067_v53 }
  0x77   :  { %358 = vmatpush1.bf16.msra.mxu1 %v1026_v27  ;;  %736 = vmatprep.subr.bf16.mxu0 %v1068_v54 }
  0x78   :  { %359 = vmatprep.subr.bf16.mxu1 %v1031_v28 }
  0x7a   :  { %737 = vmatpush1.bf16.msra.mxu0 %v1070_v55 }
  0x7b   :  { %360 = vmatpush1.bf16.msra.mxu1 %v1029_v29  ;;  %738 = vmatprep.subr.bf16.mxu0 %v1071_v56  ;;  %v1222_v56 = vmov 1966171168  }
  0x7c   :  { %361 = vmatprep.subr.bf16.mxu1 %v1034_v30 }
  0x7e   :  { %739 = vmatpush1.bf16.msra.mxu0 %v1073_v57  ;;  %v446_v57 = vunpack.c.l.s4 %v1222_v56 }
  0x7f   :  { %362 = vmatpush1.bf16.msra.mxu1 %v1032_v31  ;;  %740 = vmatprep.subr.bf16.mxu0 %v1074_v58  ;;  %v110_v58 = vlaneseq }
  0x80   :  { %363 = vmatprep.subr.bf16.mxu1 %v1037_v32 }
  0x82   :  { %741 = vmatpush1.bf16.msra.mxu0 %v1076_v59  ;;  %v447_v59 = vunpack.c.0.s8 %v446_v57 }
  0x83   :  { %364 = vmatpush1.bf16.msra.mxu1 %v1035_v33  ;;  %742 = vmatprep.subr.bf16.mxu0 %v1077_v60  ;;  %v111_v60 = vshrl.u32 %v110_v58, 7 }
  0x84   :  { %365 = vmatprep.subr.bf16.mxu1 %v1040_v34 }
  0x86   :  { %743 = vmatpush1.bf16.msra.mxu0 %v1079_v61 }
  0x87   :  { %366 = vmatpush1.bf16.msra.mxu1 %v1038_v35  ;;  %744 = vmatprep.subr.bf16.mxu0 %v1080_v62  ;;  %v1378_v62 = vsub.s32 %v447_v59, %v111_v60 }
  0x8a   :  { %384 = vmatmul.mubr.bf16.vlgmr.msra.gmra.mrb[4].mxu1 %v91_v21  ;;  %745 = vmatpush1.bf16.msra.mxu0 %v1082_v63 }
  0x8b   :  { %746 = vmatprep.subr.bf16.mxu0 %v1083_v0 }
  0x8e   :  { %747 = vmatpush1.bf16.msra.mxu0 %v1085_v1 }
  0x8f   :  { %748 = vmatprep.subr.bf16.mxu0 %v1086_v2  ;;  %v394_v2 = vld [vmem:[%s1457_s2] sm:$0x3] }
  0x92   :  { %749 = vmatpush1.bf16.msra.mxu0 %v1088_v3 }
 0x13d   :  { %v1350_v4 = vpop.f32.mrb[0].mxu1 }
 0x13e   :  { %v1352_v5 = vpop.f32.mrb[1].mxu1 }
 0x13f   :  { %v1354_v6 = vpop.f32.mrb[2].mxu1 }
 0x140   :  { %v1356_v7 = vpop.f32.mrb[3].mxu1 }
 0x15d   :  { %v1358_v8 = vpop.f32.mrb[4].mxu1 }
 0x15e   :  { %v1360_v9 = vpop.f32.mrb[5].mxu1  ;;  %v410_v11 = vmul.f32 %v1358_v8, %v1358_v8 }
 0x15f   :  { %v1362_v10 = vpop.f32.mrb[6].mxu1  ;;  %v411_v15 = vmul.f32 %v1360_v9, %v1360_v9 }
 0x160   :  { %v396_v12 = vadd.f32 %v1362_v10, %v1358_v8  ;;  %v412_v13 = vmul.f32 %v1362_v10, %v1362_v10  ;;  %v1370_v14 = vpop.f32.mrb[7].mxu1 }
 0x161   :  { %v403_v16 = vadd.f32 %v1370_v14, %v1360_v9  ;;  %v413_v17 = vmul.f32 %v1370_v14, %v1370_v14 }
 0x162   :  { %v397_v18 = vrot.slane %v396_v12, 4  ;;  %v414_v19 = vadd.f32 %v412_v13, %v410_v11  ;;  %v1385_v11 = vsub.s32 0, %v111_v60 }
 0x163   :  { %v404_v20 = vrot.slane %v403_v16, 4  ;;  %v421_v21 = vadd.f32 %v413_v17, %v411_v15 }
 0x164   :  { %v398_v22 = vadd.f32 %v397_v18, %v396_v12  ;;  %v415_v23 = vrot.slane %v414_v19, 4  ;;  %v1387_v12 = vsub.s32 1, %v111_v60 }
 0x165   :  { %v405_v24 = vadd.f32 %v404_v20, %v403_v16  ;;  %v422_v25 = vrot.slane %v421_v21, 4 }
 0x166   :  { %v399_v26 = vrot.slane %v398_v22, 2  ;;  %v416_v27 = vadd.f32 %v415_v23, %v414_v19 }
 0x167   :  { %v406_v28 = vrot.slane %v405_v24, 2  ;;  %v423_v29 = vadd.f32 %v422_v25, %v421_v21  ;;  %v395_v25 = vld [vmem:[%s1458_s3] sm:$0x3] }
 0x168   :  { %v400_v30 = vadd.f32 %v399_v26, %v398_v22  ;;  %v417_v31 = vrot.slane %v416_v27, 2 }
 0x169   :  { %v407_v32 = vadd.f32 %v406_v28, %v405_v24  ;;  %v424_v33 = vrot.slane %v423_v29, 2 }
 0x16a   :  { %v401_v34 = vrot.slane %v400_v30, 1  ;;  %v418_v35 = vadd.f32 %v417_v31, %v416_v27 }
 0x16b   :  { %v408_v36 = vrot.slane %v407_v32, 1  ;;  %v425_v37 = vadd.f32 %v424_v33, %v423_v29 }
 0x16c   :  { %v402_v38 = vadd.f32 %v401_v34, %v400_v30  ;;  %v419_v39 = vrot.slane %v418_v35, 1 }
 0x16d   :  { %v409_v40 = vadd.f32 %v408_v36, %v407_v32  ;;  %v426_v41 = vrot.slane %v425_v37, 1 }
 0x16e   :  { %v420_v42 = vadd.f32 %v419_v39, %v418_v35  ;;  %v428_v43 = vmul.f32 0.0625, %v402_v38 }
 0x16f   :  { %v427_v44 = vadd.f32 %v426_v41, %v425_v37  ;;  %v429_v45 = vmul.f32 0.0625, %v409_v40 }
 0x170   :  { %v430_v46 = vmul.f32 0.0625, %v420_v42  ;;  %v432_v47 = vmul.f32 %v428_v43, %v428_v43 }
 0x171   :  { %v431_v48 = vmul.f32 0.0625, %v427_v44  ;;  %v433_v49 = vmul.f32 %v429_v45, %v429_v45 }
 0x172   :  { %v434_v50 = vsub.f32 %v430_v46, %v432_v47 }
 0x173   :  { %v435_v51 = vsub.f32 %v431_v48, %v433_v49 }
 0x174   :  { %v436_v52 = vmax.f32 %v434_v50, 0.0 }
 0x175   :  { %v437_v53 = vmax.f32 %v435_v51, 0.0 }
 0x176   :  { %v438_v54 = vadd.f32 1e-05, %v436_v52 }
 0x177   :  { %v439_v55 = vadd.f32 1e-05, %v437_v53 }
 0x178   :  { %1089 = vrsqrt.f32 %v438_v54 }
 0x179   :  { %1091 = vrsqrt.f32 %v439_v55 }
 0x182   :  { %v1090_v61 = vpop.eup %1089 }
 0x183   :  { %v1092_v63 = vpop.eup %1091 }
 0x184   :  { %v444_v0 = vcombine.low %v1090_v61, %v1092_v63 }
 0x186   :  { %v451_v1 = vrot.slane %v444_v0, %v1378_v62 }
 0x188   :  { %v458_v3 = vrot.slane %v451_v1, %v1378_v62 }
 0x18a   :  { %v460_v13 = vmul.f32 %v458_v3, %v394_v2 }
 0x18c   :  { %v465_v15 = vrot.slane %v460_v13, %v1385_v11  ;;  %v469_v16 = vrot.slane %v460_v13, %v1387_v12 }
 0x18e   :  { %v472_v17 = vmul.f32 %v465_v15, %v428_v43  ;;  %v473_v18 = vmul.f32 %v469_v16, %v429_v45  ;;  %v496_v19 = vmul.f32 %v469_v16, %v1370_v14  ;;  %v494_v20 = vmul.f32 %v469_v16, %v1360_v9 }
 0x18f   :  { %v493_v21 = vmul.f32 %v465_v15, %v1358_v8  ;;  %v495_v22 = vmul.f32 %v465_v15, %v1362_v10 }
 0x190   :  { %v476_v23 = vcombine.low %v472_v17, %v473_v18 }
 0x192   :  { %v483_v24 = vrot.slane %v476_v23, %v1378_v62 }
 0x194   :  { %v490_v26 = vrot.slane %v483_v24, %v1378_v62 }
 0x196   :  { %v492_v27 = vsub.f32 %v395_v25, %v490_v26 }
 0x198   :  { %v501_v28 = vrot.slane %v492_v27, %v1385_v11  ;;  %v505_v14 = vrot.slane %v492_v27, %v1387_v12 }
 0x19a   :  { %v511_v29 = vadd.f32 %v505_v14, %v496_v19  ;;  %v509_v9 = vadd.f32 %v505_v14, %v494_v20  ;;  %v508_v30 = vadd.f32 %v501_v28, %v493_v21  ;;  %v510_v8 = vadd.f32 %v501_v28, %v495_v22 }
 0x19c   :  { %vm513_vm0 = vcmp.gt.f32.partialorder %v509_v9, 0.0  ;;  %vm515_vm1 = vcmp.gt.f32.partialorder %v511_v29, 0.0  ;;  %v517_v10 = vmul.f32 0.2, %v509_v9  ;;  %v519_v31 = vmul.f32 0.2, %v511_v29 }
 0x19d   :  { %vm512_vm2 = vcmp.gt.f32.partialorder %v508_v30, 0.0  ;;  %vm514_vm3 = vcmp.gt.f32.partialorder %v510_v8, 0.0  ;;  %v516_v32 = vmul.f32 0.2, %v508_v30  ;;  %v518_v33 = vmul.f32 0.2, %v510_v8 }
 0x19e   :  { %v521_v34 = vsel %vm513_vm0, %v509_v9, %v517_v10  ;;  %v523_v35 = vsel %vm515_vm1, %v511_v29, %v519_v31 }
 0x19f   :  { %v525_v36 = vpack.c.bf16 %v523_v35, %v521_v34  ;;  %v520_v37 = vsel %vm512_vm2, %v508_v30, %v516_v32  ;;  %v522_v38 = vsel %vm514_vm3, %v510_v8, %v518_v33  ;;  %v761_v35 = vld [vmem:[%s1460_s5] sm:$0x3] }
 0x1a0   :  { %v524_v39 = vpack.c.bf16 %v522_v38, %v520_v37  ;;  %v108_v37 = vld [vmem:[%s1463_s8] sm:$0x3] }
 0x1a1   :  { %750 = vmatprep.mubr.bf16.mxu0 %v525_v36 }
 0x1a2   :  { %751 = vmatmul.mubr.bf16.vlgmr.msra.gmra.mrb[0].mxu0 %v524_v39 }
 0x275   :  { %v1402_v40 = vpop.f32.mrb[0].mxu0 }
 0x276   :  { %v1404_v41 = vpop.f32.mrb[1].mxu0  ;;  %v777_v43 = vmul.f32 %v1402_v40, %v1402_v40 }
 0x277   :  { %v1406_v42 = vpop.f32.mrb[2].mxu0  ;;  %v778_v47 = vmul.f32 %v1404_v41, %v1404_v41 }
 0x278   :  { %v763_v44 = vadd.f32 %v1406_v42, %v1402_v40  ;;  %v779_v45 = vmul.f32 %v1406_v42, %v1406_v42  ;;  %v758_v46 = vpop.f32.mrb[3].mxu0 }
 0x279   :  { %v770_v48 = vadd.f32 %v758_v46, %v1404_v41  ;;  %v780_v49 = vmul.f32 %v758_v46, %v758_v46 }
 0x27a   :  { %v764_v50 = vrot.slane %v763_v44, 4  ;;  %v781_v51 = vadd.f32 %v779_v45, %v777_v43  ;;  %v117_v45 = vrot.slane %v108_v37, %v1387_v12 }
 0x27b   :  { %v771_v52 = vrot.slane %v770_v48, 4  ;;  %v788_v53 = vadd.f32 %v780_v49, %v778_v47 }
 0x27c   :  { %v765_v54 = vadd.f32 %v764_v50, %v763_v44  ;;  %v782_v55 = vrot.slane %v781_v51, 4  ;;  %v113_v44 = vrot.slane %v108_v37, %v1385_v11 }
 0x27d   :  { %v772_v56 = vadd.f32 %v771_v52, %v770_v48  ;;  %v789_v57 = vrot.slane %v788_v53, 4 }
 0x27e   :  { %v766_v58 = vrot.slane %v765_v54, 2  ;;  %v783_v59 = vadd.f32 %v782_v55, %v781_v51  ;;  %v237_v55 = vadd.f32 %v1352_v5, %v117_v45 }
 0x27f   :  { %v773_v60 = vrot.slane %v772_v56, 2  ;;  %v790_v61 = vadd.f32 %v789_v57, %v788_v53  ;;  %v239_v57 = vadd.f32 %v1354_v6, %v113_v44 }
 0x280   :  { %v767_v63 = vadd.f32 %v766_v58, %v765_v54  ;;  %v784_v0 = vrot.slane %v783_v59, 2  ;;  %v235_v54 = vadd.f32 %v1350_v4, %v113_v44  ;;  %v241_v58 = vadd.f32 %v1356_v7, %v117_v45 }
 0x281   :  { %v774_v1 = vadd.f32 %v773_v60, %v772_v56  ;;  %v791_v2 = vrot.slane %v790_v61, 2  ;;  %vm244_vm5 = vcmp.gt.f32.partialorder %v237_v55, 0.0  ;;  %v249_v4 = vmul.f32 0.2, %v239_v57 }
 0x282   :  { %v768_v3 = vrot.slane %v767_v63, 1  ;;  %v785_v13 = vadd.f32 %v784_v0, %v783_v59  ;;  %vm243_vm4 = vcmp.gt.f32.partialorder %v235_v54, 0.0  ;;  %v248_v59 = vmul.f32 0.2, %v237_v55 }
 0x283   :  { %v775_v15 = vrot.slane %v774_v1, 1  ;;  %v792_v16 = vadd.f32 %v791_v2, %v790_v61  ;;  %v250_v60 = vmul.f32 0.2, %v241_v58  ;;  %vm245_vm6 = vcmp.gt.f32.partialorder %v239_v57, 0.0 }
 0x284   :  { %v769_v17 = vadd.f32 %v768_v3, %v767_v63  ;;  %v786_v18 = vrot.slane %v785_v13, 1  ;;  %vm246_vm7 = vcmp.gt.f32.partialorder %v241_v58, 0.0  ;;  %v252_v2 = vsel %vm244_vm5, %v237_v55, %v248_v59 }
 0x285   :  { %v776_v19 = vadd.f32 %v775_v15, %v774_v1  ;;  %v793_v20 = vrot.slane %v792_v16, 1  ;;  %v254_v3 = vsel %vm246_vm7, %v241_v58, %v250_v60 }
 0x286   :  { %v787_v21 = vadd.f32 %v786_v18, %v785_v13  ;;  %v795_v22 = vmul.f32 0.0625, %v769_v17 }
 0x287   :  { %v794_v23 = vadd.f32 %v793_v20, %v792_v16  ;;  %v796_v24 = vmul.f32 0.0625, %v776_v19 }
 0x288   :  { %v797_v25 = vmul.f32 0.0625, %v787_v21  ;;  %v799_v26 = vmul.f32 %v795_v22, %v795_v22 }
 0x289   :  { %v798_v27 = vmul.f32 0.0625, %v794_v23  ;;  %v800_v28 = vmul.f32 %v796_v24, %v796_v24 }
 0x28a   :  { %v801_v14 = vsub.f32 %v797_v25, %v799_v26 }
 0x28b   :  { %v802_v29 = vsub.f32 %v798_v27, %v800_v28 }
 0x28c   :  { %v803_v9 = vmax.f32 %v801_v14, 0.0 }
 0x28d   :  { %v804_v30 = vmax.f32 %v802_v29, 0.0 }
 0x28e   :  { %v805_v8 = vadd.f32 1e-05, %v803_v9 }
 0x28f   :  { %v806_v10 = vadd.f32 1e-05, %v804_v30 }
 0x290   :  { %1093 = vrsqrt.f32 %v805_v8 }
 0x291   :  { %1095 = vrsqrt.f32 %v806_v10 }
 0x29a   :  { %v1094_v31 = vpop.eup %1093 }
 0x29b   :  { %v1096_v32 = vpop.eup %1095 }
 0x29c   :  { %v811_v33 = vcombine.low %v1094_v31, %v1096_v32 }
 0x29e   :  { %v818_v34 = vrot.slane %v811_v33, %v1378_v62 }
 0x2a0   :  { %v825_v36 = vrot.slane %v818_v34, %v1378_v62 }
 0x2a2   :  { %v827_v38 = vmul.f32 %v825_v36, %v761_v35 }
 0x2a4   :  { %v832_v39 = vrot.slane %v827_v38, %v1385_v11  ;;  %v836_v43 = vrot.slane %v827_v38, %v1387_v12 }
 0x2a6   :  { %v839_v47 = vmul.f32 %v832_v39, %v795_v22  ;;  %v840_v48 = vmul.f32 %v836_v43, %v796_v24  ;;  %v860_v49 = vmul.f32 %v832_v39, %v1402_v40  ;;  %v861_v50 = vmul.f32 %v836_v43, %v1404_v41  ;;  %v762_v40 = vld [vmem:[%s1461_s6] sm:$0x3]  ;;  %s1223_s6 = smov [#allocation10]  }
 0x2a7   :  { %v862_v51 = vmul.f32 %v832_v39, %v1406_v42  ;;  %v863_v52 = vmul.f32 %v836_v43, %v758_v46  ;;  %v247_v42 = vmul.f32 0.2, %v235_v54  ;;  %s904_s19 = sshll.u32 %s1223_s6, 4  ;;  %s905_s19 = int_to_ptr.vmem [resolvable:$true] %s904_s19 }
 0x2a8   :  { %v843_v53 = vcombine.low %v839_v47, %v840_v48  ;;  %s1185_s20 = scalar_lea.vmem %s905_s19, 512  ;;  %p1190_p5 = scmp.lt.s32.totalorder %s905_s19, %s905_s19 }
 0x2a9   :  { %v251_v1 = vsel %vm243_vm4, %v235_v54, %v247_v42  ;;  %p1186_p4 = scmp.ne.s32.totalorder %s905_s19, %s1185_s20  ;;  %p1191_p6 = scmp.lt.s32.totalorder %s1185_s20, %s1185_s20 }
 0x2aa   :  { %v850_v56 = vrot.slane %v843_v53, %v1378_v62 }
 0x2ab   :  { %p1192_p7 = por %p1191_p6, %p1190_p5 }
 0x2ac   :  { %v857_v41 = vrot.slane %v850_v56, %v1378_v62  ;;  %v253_v62 = vsel %vm245_vm6, %v239_v57, %v249_v4 }
 0x2ad   :  { %p1193_p8 = pnand %p1192_p7, %p1186_p4 }
 0x2ae   :  { %v859_v46 = vsub.f32 %v762_v40, %v857_v41 }
 0x2b0   :  { %v868_v5 = vrot.slane %v859_v46, %v1385_v11  ;;  %v872_v6 = vrot.slane %v859_v46, %v1387_v12 }
 0x2b2   :  { %v875_v7 = vadd.f32 %v868_v5, %v860_v49  ;;  %v876_v61 = vadd.f32 %v872_v6, %v861_v50  ;;  %v877_v63 = vadd.f32 %v868_v5, %v862_v51  ;;  %v878_v0 = vadd.f32 %v872_v6, %v863_v52 }
 0x2b4   :  { %v879_v13 = vadd.f32 %v875_v7, %v251_v1  ;;  %v880_v15 = vadd.f32 %v876_v61, %v252_v2  ;;  %v881_v16 = vadd.f32 %v877_v63, %v253_v62  ;;  %v882_v17 = vadd.f32 %v878_v0, %v254_v3 }
 0x2b6   :  { %vm883_vm8 = vcmp.gt.f32.partialorder %v879_v13, 0.0  ;;  %vm884_vm9 = vcmp.gt.f32.partialorder %v880_v15, 0.0  ;;  %vm885_vm10 = vcmp.gt.f32.partialorder %v881_v16, 0.0  ;;  %vm886_vm11 = vcmp.gt.f32.partialorder %v882_v17, 0.0 }
 0x2b7   :  { %v887_v11 = vmul.f32 0.2, %v879_v13  ;;  %v888_v12 = vmul.f32 0.2, %v880_v15  ;;  %v889_v18 = vmul.f32 0.2, %v881_v16 }
 0x2b8   :  { %v890_v19 = vmul.f32 0.2, %v882_v17 }
 0x2b9   :  { %v892_v20 = vsel %vm884_vm9, %v880_v15, %v888_v12  ;;  %v891_v21 = vsel %vm883_vm8, %v879_v13, %v887_v11  ;;  %v893_v22 = vsel %vm885_vm10, %v881_v16, %v889_v18 }
 0x2ba   :  { %v894_v23 = vsel %vm886_vm11, %v882_v17, %v890_v19  ;;  %896 = vst [vmem:[#allocation10 + $0x8] sm:$0xff] %v892_v20  ;;  %895 = vst [vmem:[#allocation10] sm:$0xff] %v891_v21 }
 0x2bb   :  { %897 = vst [vmem:[#allocation10 + $0x10] sm:$0xff] %v893_v22  ;;  %898 = vst [vmem:[#allocation10 + $0x18] sm:$0xff] %v894_v23 }
 0x2bc   :  { %1196 = shalt.err (!%p1193_p8)
}
 0x2bd   :  { %s1197_s25 = scalar_lea.hbm %s1464_s9, 512 }
 0x2be   :  { %p1198_p9 = scmp.ne.s32.totalorder %s1464_s9, %s1197_s25  ;;  %p1201_p10 = scmp.lt.u32.totalorder %s1197_s25, %s1464_s9 }
 0x2c0   :  { %p1203_p11 = pnand %p1201_p10, %p1198_p9 }
 0x2c2   :  { %1206 = shalt.err (!%p1203_p11)
}
 0x2c3   :  { %s1224_s28 = smov 256   ;;  %s1225_s29 = smov 16  }
 0x2c4   :  { %910 = dma.vmem_to_hbm [thread:$0]  %s905_s19, 512, %s1464_s9, [#allocation4], %s1224_s28, %s1224_s28, %s1225_s29  }
 0x2c5   :  { %1213 = dma.done.wait [#allocation4], 512  }
 0x2c6   :  { %1214 = vsyncadd [#allocation4], 4294966784 }
 0x2c7   :  { %914 = vsyncpa [#allocation3], 1 }
 0x2c8   :  { %915 = vsyncpa [#allocation6], 1 }
 0x2c9   :  { %916 = vsyncpa [#allocation9], 1 }
 0x2ca   :  { %917 = vsyncpa [#allocation4], 1 }

</bundles_post_ra>
